<compile_context>
chip_gen: v7x
topology: tpu7x:2x2x1
jax: 0.10.0
libtpu: 0.0.40
codegen_flags: <defaults>
</compile_context>

<pallas_src>
import functools

import jax
import jax.numpy as jnp
from jax.experimental import pallas as pl
from jax.experimental.pallas import tpu as pltpu


# ---------------------------------------------------------------------------
# Fused kernel: whole MLP in one body, transposed (lane-dense) activations.
# ---------------------------------------------------------------------------
def _fused_mlp_kernel(*refs, relu_flags, stacked):
    # refs = (xT_ref, w_refs..., oT_ref)
    x_ref = refs[0]
    o_ref = refs[-1]

    h = x_ref[...]                        # (inp_dim, tm): batch on lanes
    if h.dtype != jnp.float32:
        h = h.astype(jnp.float32)

    if stacked:
        w_ref, b_ref = refs[1], refs[2]   # (L, N, K) and (L, N, 1), resident
        for i, do_relu in enumerate(relu_flags):
            h = jnp.dot(w_ref[i], h, preferred_element_type=jnp.float32) + b_ref[i]
            if do_relu:
                h = jnp.maximum(h, 0.0)
    else:
        wb = refs[1:-1]                   # per-layer fallback (non-uniform dims)
        for i, do_relu in enumerate(relu_flags):
            w = wb[2 * i][...]            # (N_i, K_i)
            b = wb[2 * i + 1][...]        # (N_i, 1), broadcasts over lanes
            h = jnp.dot(w, h, preferred_element_type=jnp.float32) + b
            if do_relu:
                h = jnp.maximum(h, 0.0)

    if h.dtype != o_ref.dtype:
        h = h.astype(o_ref.dtype)
    o_ref[...] = h                        # (out_dim, tm): unmasked lane-dense store


def mlp2_forward(x, params, relu=True, *, tm_cap=8192, out_transposed=False):
    """Whole MLP2 forward in a single fused pallas_call.

    x:      (M, inp_dim) float32
    params: list of (w_t, b) with w_t (in_dim, out_dim), b (out_dim,)
    relu:   ReLU after the final layer (hidden layers always get ReLU).
    """
    # TODO(synk): dropout (p=0.5) and LayerNorm branches of MLP2 are disabled in
    # this config (dropout=False, norm=False) and are not implemented in-kernel.
    # TODO(synk): optionally cast x / weights to bfloat16 (keep f32 accumulate)
    # to halve HBM traffic, if callers tolerate bf16 I/O.
    n_layers = len(params)
    relu_flags = tuple((i < n_layers - 1) or relu for i in range(n_layers))

    M, K0 = x.shape
    N_last = params[-1][0].shape[1]
    LANE = 128

    # ---- batch tiling: lane-granular blocks, >= 2 blocks once M >= 256 ------
    if M < 2 * LANE:
        # Single full-extent block (block dim == full array dim), no padding.
        grid_m, tm, M_total = 1, M, M
    else:
        n_chunks = pl.cdiv(M, LANE)                              # 128-row granules
        grid_m = max(2, pl.cdiv(n_chunks, max(tm_cap // LANE, 1)))
        cpb = pl.cdiv(n_chunks, grid_m)                          # granules / block
        grid_m = pl.cdiv(n_chunks, cpb)
        tm = cpb * LANE
        M_total = grid_m * tm                                    # pad <= grid_m*127 rows

    # ---- lane-dense (transposed) input; pad fuses into the transpose --------
    xT = x.T                                                     # (K0, M)
    if M_total != M:
        xT = jnp.pad(xT, ((0, 0), (0, M_total - M)))

    # ---- resident weights: stacked when layer dims are uniform --------------
    stacked = len({w.shape for w, _ in params}) == 1
    inputs = [xT]
    in_specs = [pl.BlockSpec((K0, tm), lambda i: (0, i))]
    if stacked:
        w_stack = jnp.stack([w.T for w, _ in params])            # (L, N, K)
        b_stack = jnp.stack([b.reshape(-1, 1) for _, b in params])  # (L, N, 1)
        inputs += [w_stack, b_stack]
        in_specs += [
            pl.BlockSpec(w_stack.shape, lambda i: (0, 0, 0)),    # constant -> resident
            pl.BlockSpec(b_stack.shape, lambda i: (0, 0, 0)),
        ]
    else:
        for w, b in params:
            w_pt = w.T                                           # (N_i, K_i)
            inputs += [w_pt, b.reshape(-1, 1)]
            in_specs += [
                pl.BlockSpec(w_pt.shape, lambda i: (0, 0)),
                pl.BlockSpec((w_pt.shape[0], 1), lambda i: (0, 0)),
            ]

    kernel = functools.partial(_fused_mlp_kernel,
                               relu_flags=relu_flags, stacked=stacked)

    outT = pl.pallas_call(
        kernel,
        out_shape=jax.ShapeDtypeStruct((N_last, M_total), x.dtype),
        grid_spec=pltpu.PrefetchScalarGridSpec(
            num_scalar_prefetch=0,
            grid=(grid_m,),
            in_specs=in_specs,
            out_specs=pl.BlockSpec((N_last, tm), lambda i: (0, i)),
        ),
        compiler_params=pltpu.CompilerParams(
            dimension_semantics=("parallel",),
            vmem_limit_bytes=32 * 1024 * 1024,
        ),
    )(*inputs)

    if M_total != M:
        outT = outT[:, :M]
    if out_transposed:
        return outT            # (out_dim, M): lane-dense layout for fused consumers
    return outT.T              # (M, out_dim): matches nn.Module forward semantics


# ---------------------------------------------------------------------------
# Parameter init mimicking nn.Linear (uniform +-1/sqrt(fan_in)).
# ---------------------------------------------------------------------------
def init_mlp2_params(key, inp_dim, out_dim, num_layers=1, layers=()):
    layers = list(layers)
    dims = []
    incoming = inp_dim
    for _ in range(num_layers - 1):
        outgoing = incoming if len(layers) == 0 else layers.pop(0)
        dims.append((incoming, outgoing))
        incoming = outgoing
    dims.append((incoming, out_dim))

    params = []
    for (fan_in, fan_out) in dims:
        key, kw, kb = jax.random.split(key, 3)
        bound = 1.0 / jnp.sqrt(jnp.float32(fan_in))
        # PyTorch Linear weight is (out, in); store transposed (in, out).
        w_t = jax.random.uniform(kw, (fan_in, fan_out), jnp.float32,
                                 minval=-bound, maxval=bound)
        b = jax.random.uniform(kb, (fan_out,), jnp.float32,
                               minval=-bound, maxval=bound)
        params.append((w_t, b))
    return params


if __name__ == "__main__":
    key = jax.random.PRNGKey(0)
    k_x, k_p = jax.random.split(key)

    B, INP, OUT = 8, 32, 32
    NUM_LAYERS = 3

    x = jax.random.normal(k_x, (B, INP), jnp.float32)
    params = init_mlp2_params(k_p, INP, OUT, num_layers=NUM_LAYERS)

    def ref_forward(xx):
        h = xx
        for (w_t, b) in params:          # relu=True -> ReLU after every layer
            h = jnp.maximum(h @ w_t + b, 0.0)
        return h

    y = mlp2_forward(x, params, relu=True)
    jax.block_until_ready(y)
    ref = ref_forward(x)
    assert y.shape == ref.shape, "shape mismatch vs reference"
    assert jnp.allclose(y, ref, atol=1e-5, rtol=1e-5), "mismatch vs reference"

    # tiny non-multiple-of-8 batch (single full-extent block, no padding path)
    x2 = jax.random.normal(jax.random.PRNGKey(1), (5, INP), jnp.float32)
    y2 = mlp2_forward(x2, params, relu=True)
    jax.block_until_ready(y2)
    assert jnp.allclose(y2, ref_forward(x2), atol=1e-5, rtol=1e-5), "tiny-batch mismatch"

    # batch large enough to exercise the multi-block (grid_m >= 2) + lane-pad path
    x3 = jax.random.normal(jax.random.PRNGKey(2), (300, INP), jnp.float32)
    y3 = mlp2_forward(x3, params, relu=True)
    jax.block_until_ready(y3)
    assert jnp.allclose(y3, ref_forward(x3), atol=1e-5, rtol=1e-5), "multi-block mismatch"

    print("KERNEL_OK")
</pallas_src>

<mosaic_0001>
module attributes {stable_mosaic.version = 11 : i64} {
  func.func @_fused_mlp_kernel(%arg0: i32, %arg1: memref<32x8xf32, #tpu.memory_space<vmem>>, %arg2: memref<3x32x32xf32, #tpu.memory_space<vmem>>, %arg3: memref<3x32x1xf32, #tpu.memory_space<vmem>>, %arg4: memref<32x8xf32, #tpu.memory_space<vmem>>) attributes {dimension_semantics = [#tpu.dimension_semantics<parallel>], iteration_bounds = array<i64: 1>, scalar_prefetch = 0 : i64, scratch_operands = 0 : i64, tpu.core_type = #tpu.core_type<tc>, window_params = [{transform_indices = @transform_0, window_bounds = array<i64: 32, 8>}, {pipeline_mode = #tpu.pipeline_mode<synchronous>, transform_indices = @transform_1, window_bounds = array<i64: 3, 32, 32>}, {pipeline_mode = #tpu.pipeline_mode<synchronous>, transform_indices = @transform_2, window_bounds = array<i64: 3, 32, 1>}, {transform_indices = @transform_3, window_bounds = array<i64: 32, 8>}]} {
    %c0 = arith.constant 0 : index
    %c0_0 = arith.constant 0 : index
    %0 = vector.load %arg1[%c0, %c0_0] : memref<32x8xf32, #tpu.memory_space<vmem>>, vector<32x8xf32>
    %c0_1 = arith.constant 0 : index
    %c0_2 = arith.constant 0 : index
    %c0_3 = arith.constant 0 : index
    %1 = vector.load %arg2[%c0_1, %c0_2, %c0_3] : memref<3x32x32xf32, #tpu.memory_space<vmem>>, vector<1x32x32xf32>
    %2 = vector.shape_cast %1 : vector<1x32x32xf32> to vector<32x32xf32>
    %cst = arith.constant dense<0.000000e+00> : vector<32x8xf32>
    %3 = tpu.matmul %2, %0, %cst {dimension_numbers = #tpu.dot_dimension_numbers<[1], [0], [0], [1], [0, 0, 1, 1], [], []>} : vector<32x32xf32>, vector<32x8xf32>, vector<32x8xf32> -> vector<32x8xf32>
    %c0_4 = arith.constant 0 : index
    %c0_5 = arith.constant 0 : index
    %c0_6 = arith.constant 0 : index
    %4 = vector.load %arg3[%c0_4, %c0_5, %c0_6] : memref<3x32x1xf32, #tpu.memory_space<vmem>>, vector<1x32x1xf32>
    %5 = vector.shape_cast %4 : vector<1x32x1xf32> to vector<32x1xf32>
    %6 = vector.broadcast %5 : vector<32x1xf32> to vector<32x8xf32>
    %7 = arith.addf %3, %6 : vector<32x8xf32>
    %cst_7 = arith.constant 0.000000e+00 : f32
    %8 = vector.broadcast %cst_7 : f32 to vector<32x8xf32>
    %9 = arith.maximumf %7, %8 : vector<32x8xf32>
    %c1 = arith.constant 1 : index
    %c0_8 = arith.constant 0 : index
    %c0_9 = arith.constant 0 : index
    %10 = vector.load %arg2[%c1, %c0_8, %c0_9] : memref<3x32x32xf32, #tpu.memory_space<vmem>>, vector<1x32x32xf32>
    %11 = vector.shape_cast %10 : vector<1x32x32xf32> to vector<32x32xf32>
    %cst_10 = arith.constant dense<0.000000e+00> : vector<32x8xf32>
    %12 = tpu.matmul %11, %9, %cst_10 {dimension_numbers = #tpu.dot_dimension_numbers<[1], [0], [0], [1], [0, 0, 1, 1], [], []>} : vector<32x32xf32>, vector<32x8xf32>, vector<32x8xf32> -> vector<32x8xf32>
    %c1_11 = arith.constant 1 : index
    %c0_12 = arith.constant 0 : index
    %c0_13 = arith.constant 0 : index
    %13 = vector.load %arg3[%c1_11, %c0_12, %c0_13] : memref<3x32x1xf32, #tpu.memory_space<vmem>>, vector<1x32x1xf32>
    %14 = vector.shape_cast %13 : vector<1x32x1xf32> to vector<32x1xf32>
    %15 = vector.broadcast %14 : vector<32x1xf32> to vector<32x8xf32>
    %16 = arith.addf %12, %15 : vector<32x8xf32>
    %cst_14 = arith.constant 0.000000e+00 : f32
    %17 = vector.broadcast %cst_14 : f32 to vector<32x8xf32>
    %18 = arith.maximumf %16, %17 : vector<32x8xf32>
    %c2 = arith.constant 2 : index
    %c0_15 = arith.constant 0 : index
    %c0_16 = arith.constant 0 : index
    %19 = vector.load %arg2[%c2, %c0_15, %c0_16] : memref<3x32x32xf32, #tpu.memory_space<vmem>>, vector<1x32x32xf32>
    %20 = vector.shape_cast %19 : vector<1x32x32xf32> to vector<32x32xf32>
    %cst_17 = arith.constant dense<0.000000e+00> : vector<32x8xf32>
    %21 = tpu.matmul %20, %18, %cst_17 {dimension_numbers = #tpu.dot_dimension_numbers<[1], [0], [0], [1], [0, 0, 1, 1], [], []>} : vector<32x32xf32>, vector<32x8xf32>, vector<32x8xf32> -> vector<32x8xf32>
    %c2_18 = arith.constant 2 : index
    %c0_19 = arith.constant 0 : index
    %c0_20 = arith.constant 0 : index
    %22 = vector.load %arg3[%c2_18, %c0_19, %c0_20] : memref<3x32x1xf32, #tpu.memory_space<vmem>>, vector<1x32x1xf32>
    %23 = vector.shape_cast %22 : vector<1x32x1xf32> to vector<32x1xf32>
    %24 = vector.broadcast %23 : vector<32x1xf32> to vector<32x8xf32>
    %25 = arith.addf %21, %24 : vector<32x8xf32>
    %cst_21 = arith.constant 0.000000e+00 : f32
    %26 = vector.broadcast %cst_21 : f32 to vector<32x8xf32>
    %27 = arith.maximumf %25, %26 : vector<32x8xf32>
    %c0_22 = arith.constant 0 : index
    %c0_23 = arith.constant 0 : index
    %28 = vector.load %arg4[%c0_22, %c0_23] : memref<32x8xf32, #tpu.memory_space<vmem>>, vector<32x8xf32>
    tpu.vector_store %arg4[%c0_22, %c0_23], %27 {strides = array<i32>} : memref<32x8xf32, #tpu.memory_space<vmem>>, vector<32x8xf32>,
    return
  }
  func.func @transform_0(%arg0: i32) -> (i32, i32) {
    %c0_i32 = arith.constant 0 : i32
    %c0_i32_0 = arith.constant 0 : i32
    return %c0_i32, %arg0 : i32, i32
  }
  func.func @transform_1(%arg0: i32) -> (i32, i32, i32) {
    %c0_i32 = arith.constant 0 : i32
    %c0_i32_0 = arith.constant 0 : i32
    %c0_i32_1 = arith.constant 0 : i32
    %c0_i32_2 = arith.constant 0 : i32
    return %c0_i32, %c0_i32_0, %c0_i32_1 : i32, i32, i32
  }
  func.func @transform_2(%arg0: i32) -> (i32, i32, i32) {
    %c0_i32 = arith.constant 0 : i32
    %c0_i32_0 = arith.constant 0 : i32
    %c0_i32_1 = arith.constant 0 : i32
    %c0_i32_2 = arith.constant 0 : i32
    return %c0_i32, %c0_i32_0, %c0_i32_1 : i32, i32, i32
  }
  func.func @transform_3(%arg0: i32) -> (i32, i32) {
    %c0_i32 = arith.constant 0 : i32
    %c0_i32_0 = arith.constant 0 : i32
    return %c0_i32, %arg0 : i32, i32
  }
}

</mosaic_0001>

<bundles_post_ra>
// kernel: tpu_custom_call.1
= control target key start
LH: loop header
LB: loop body
LE: loop exit
PB: predicated region body
PF: predicated region fallthrough
CT: control target
= control target key end

     0   :  { %vm46_vm0 = vcmask 261120   ;;  %v544_v3 = vmov 0   ;;  %vm410_vm1 = vcmask 64512   ;;  %s673_s0 = inlined_call_operand.vmem [shape: f32[32,8], index: 0, kind: input, shape index: {}]   ;;  %s674_s1 = inlined_call_operand.vmem [shape: f32[3,32,32], index: 1, kind: input, shape index: {}]   ;;  %s675_s2 = inlined_call_operand.vmem [shape: f32[3,32,1], index: 2, kind: input, shape index: {}]   ;;  %s676_s3 = inlined_call_operand.vmem [shape: f32[32,8], index: 3, kind: output, shape index: {}]  }
   0x1   :  { %v14_v0 = vld [vmem:[%s673_s0] sm:$0xff]  ;;  %v15_v1 = vld [vmem:[%s673_s0 + $0x8] sm:$0xff]  ;;  %v16_v2 = vld [vmem:[%s673_s0 + $0x10] sm:$0xff]  ;;  %542 = vset.pattern.permute.xlu0 %v544_v3  ;;  %543 = vset.pattern.permute.xlu1 %v544_v3 }
   0x2   :  { %v513_v4 = vpack.c.bf16 %v15_v1, %v14_v0  ;;  %v17_v5 = vld [vmem:[%s673_s0 + $0x18] sm:$0xff]  ;;  %v18_v6 = vld [vmem:[%s674_s1] sm:$0xff]  ;;  %v24_v9 = vld [vmem:[%s675_s2 + $0x10] sm:$0xff] }
   0x3   :  { %v517_v7 = vpack.c.bf16 %v17_v5, %v16_v2  ;;  %479 = vmatprep.mubr.msk.f32.mxu0 %vm46_vm0, %v18_v6  ;;  %v22_v8 = vld [vmem:[%s675_s2] sm:$0xff]  ;;  %38 = vperm.xlu1 %543, %v24_v9   ;;  %v23_v10 = vld [vmem:[%s675_s2 + $0x8] sm:$0xff]  ;;  %v25_v11 = vld [vmem:[%s675_s2 + $0x18] sm:$0xff] }
   0x4   :  { %514 = vmatprep.subr.bf16.mxu0 %v513_v4  ;;  %28 = vperm.xlu0 %542, %v22_v8   ;;  %v19_v12 = vld [vmem:[%s674_s1 + $0x8] sm:$0xff]  ;;  %v427_v13 = vld [vmem:[%s675_s2 + $0x20] sm:$0xff]  ;;  %v20_v14 = vld [vmem:[%s674_s1 + $0x10] sm:$0xff] }
   0x5   :  { %516 = vmatpush3.bf16.msra.mxu0 %v513_v4  ;;  %v428_v15 = vld [vmem:[%s675_s2 + $0x28] sm:$0xff]  ;;  %v21_v16 = vld [vmem:[%s674_s1 + $0x18] sm:$0xff]  ;;  %v429_v17 = vld [vmem:[%s675_s2 + $0x30] sm:$0xff] }
   0x6   :  { %518 = vmatprep.subr.bf16.mxu0 %v517_v7  ;;  %v430_v18 = vld [vmem:[%s675_s2 + $0x38] sm:$0xff]  ;;  %v439_v19 = vld [vmem:[%s675_s2 + $0x40] sm:$0xff]  ;;  %v440_v20 = vld [vmem:[%s675_s2 + $0x48] sm:$0xff] }
   0x7   :  { %43 = vperm.xlu1 %543, %v25_v11   ;;  %v441_v21 = vld [vmem:[%s675_s2 + $0x50] sm:$0xff]  ;;  %v442_v22 = vld [vmem:[%s675_s2 + $0x58] sm:$0xff]  ;;  %v423_v23 = vld [vmem:[%s674_s1 + $0x20] sm:$0xff] }
   0x8   :  { %33 = vperm.xlu0 %542, %v23_v10   ;;  %493 = vmatprep.mubr.msk.f32.mxu1 %vm46_vm0, %v423_v23  ;;  %v424_v42 = vld [vmem:[%s674_s1 + $0x28] sm:$0xff]  ;;  %v425_v43 = vld [vmem:[%s674_s1 + $0x30] sm:$0xff]  ;;  %v426_v44 = vld [vmem:[%s674_s1 + $0x38] sm:$0xff] }
   0x9   :  { %520 = vmatpush3.bf16.msra.mxu0 %v517_v7  ;;  %v435_v45 = vld [vmem:[%s674_s1 + $0x40] sm:$0xff]  ;;  %v437_v46 = vld [vmem:[%s674_s1 + $0x50] sm:$0xff]  ;;  %v436_v1 = vld [vmem:[%s674_s1 + $0x48] sm:$0xff] }
   0xa   :  { %v438_v2 = vld [vmem:[%s674_s1 + $0x58] sm:$0xff] }
   0xb   :  { %165 = vperm.xlu1 %543, %v428_v15  }
   0xc   :  { %480 = vmatmul.mubr.msk.f32.vlgmr.msra.gmra.mrb[0].mxu0 %vm46_vm0, %v19_v12  ;;  %160 = vperm.xlu0 %542, %v427_v13  }
   0xd   :  { %482 = vmatprep.mubr.msk.f32.mxu0 %vm46_vm0, %v20_v14 }
   0xf   :  { %175 = vperm.xlu1 %543, %v430_v18  }
  0x10   :  { %483 = vmatmul.mubr.msk.f32.gmra.mrb[2].mxu0 %vm46_vm0, %v21_v16  ;;  %170 = vperm.xlu0 %542, %v429_v17  }
  0x11   :  { %507 = vmatprep.mubr.msk.f32.mxu0 %vm46_vm0, %v435_v45 }
  0x13   :  { %296 = vperm.xlu1 %543, %v440_v20  }
  0x14   :  { %291 = vperm.xlu0 %542, %v439_v19  }
  0x17   :  { %306 = vperm.xlu1 %543, %v442_v22  }
  0x18   :  { %301 = vperm.xlu0 %542, %v441_v21  }
  0x82   :  { %v39_v25 = vpop.permute.xlu1 %38 }
  0x83   :  { %v29_v24 = vpop.permute.xlu0 %28 }
  0x86   :  { %v44_v32 = vpop.permute.xlu1 %43 }
  0x87   :  { %v34_v26 = vpop.permute.xlu0 %33 }
  0x8a   :  { %v166_v47 = vpop.permute.xlu1 %165 }
  0x8b   :  { %v161_v48 = vpop.permute.xlu0 %160 }
  0x8e   :  { %v176_v54 = vpop.permute.xlu1 %175 }
  0x8f   :  { %v171_v57 = vpop.permute.xlu0 %170 }
  0x92   :  { %v297_v4 = vpop.permute.xlu1 %296 }
  0x93   :  { %v292_v3 = vpop.permute.xlu0 %291 }
  0x96   :  { %v307_v6 = vpop.permute.xlu1 %306 }
  0x97   :  { %v302_v5 = vpop.permute.xlu0 %301 }
  0xdf   :  { %v481_v27 = vpop.f32.mrb[0].mxu0 }
  0xe0   :  { %v131_v28 = vadd.f32 %v481_v27, %v34_v26  ;;  %v125_v29 = vpop.f32.mrb[1].mxu0 }
  0xe1   :  { %v126_v30 = vadd.f32 %v125_v29, %v29_v24 }
  0xe2   :  { %v145_v31 = vmax.f32 %v131_v28, 0.0 }
  0xe3   :  { %v144_v33 = vmax.f32 %v126_v30, 0.0  ;;  %v484_v34 = vpop.f32.mrb[2].mxu0 }
  0xe4   :  { %v141_v35 = vadd.f32 %v484_v34, %v44_v32  ;;  %v135_v36 = vpop.f32.mrb[3].mxu0 }
  0xe5   :  { %v136_v37 = vadd.f32 %v135_v36, %v39_v25  ;;  %v521_v38 = vpack.c.bf16 %v145_v31, %v144_v33 }
  0xe6   :  { %v147_v39 = vmax.f32 %v141_v35, 0.0 }
  0xe7   :  { %v146_v40 = vmax.f32 %v136_v37, 0.0  ;;  %522 = vmatprep.subr.bf16.mxu1 %v521_v38 }
  0xe8   :  { %524 = vmatpush3.bf16.msra.mxu1 %v521_v38 }
  0xe9   :  { %v525_v41 = vpack.c.bf16 %v147_v39, %v146_v40 }
  0xeb   :  { %526 = vmatprep.subr.bf16.mxu1 %v525_v41 }
  0xec   :  { %528 = vmatpush3.bf16.msra.mxu1 %v525_v41 }
  0xef   :  { %494 = vmatmul.mubr.msk.f32.vlgmr.msra.gmra.mrb[0].mxu1 %vm46_vm0, %v424_v42 }
  0xf0   :  { %496 = vmatprep.mubr.msk.f32.mxu1 %vm46_vm0, %v425_v43 }
  0xf3   :  { %497 = vmatmul.mubr.msk.f32.gmra.mrb[2].mxu1 %vm46_vm0, %v426_v44 }
  0xf4   :  { %510 = vmatprep.mubr.msk.f32.mxu1 %vm46_vm0, %v437_v46 }
 0x1c2   :  { %v495_v49 = vpop.f32.mrb[0].mxu1 }
 0x1c3   :  { %v262_v50 = vadd.f32 %v495_v49, %v166_v47  ;;  %v256_v51 = vpop.f32.mrb[1].mxu1 }
 0x1c4   :  { %v257_v52 = vadd.f32 %v256_v51, %v161_v48 }
 0x1c5   :  { %v276_v53 = vmax.f32 %v262_v50, 0.0 }
 0x1c6   :  { %v275_v55 = vmax.f32 %v257_v52, 0.0  ;;  %v498_v56 = vpop.f32.mrb[2].mxu1 }
 0x1c7   :  { %v272_v58 = vadd.f32 %v498_v56, %v176_v54  ;;  %v266_v59 = vpop.f32.mrb[3].mxu1 }
 0x1c8   :  { %v529_v60 = vpack.c.bf16 %v276_v53, %v275_v55  ;;  %v267_v61 = vadd.f32 %v266_v59, %v171_v57 }
 0x1c9   :  { %v278_v62 = vmax.f32 %v272_v58, 0.0 }
 0x1ca   :  { %v277_v63 = vmax.f32 %v267_v61, 0.0  ;;  %530 = vmatprep.subr.bf16.mxu0 %v529_v60  ;;  %537 = vmatprep.subr.bf16.mxu1 %v529_v60 }
 0x1cb   :  { %532 = vmatpush3.bf16.msra.mxu0 %v529_v60  ;;  %539 = vmatpush3.bf16.msra.mxu1 %v529_v60 }
 0x1cc   :  { %v533_v0 = vpack.c.bf16 %v278_v62, %v277_v63 }
 0x1ce   :  { %534 = vmatprep.subr.bf16.mxu0 %v533_v0  ;;  %538 = vmatprep.subr.bf16.mxu1 %v533_v0 }
 0x1cf   :  { %536 = vmatpush3.bf16.msra.mxu0 %v533_v0  ;;  %540 = vmatpush3.bf16.msra.mxu1 %v533_v0 }
 0x1d2   :  { %508 = vmatmul.mubr.msk.f32.vlgmr.msra.gmra.mrb[4].mxu0 %vm46_vm0, %v436_v1  ;;  %511 = vmatmul.mubr.msk.f32.vlgmr.msra.gmra.mrb[4].mxu1 %vm46_vm0, %v438_v2 }
 0x2a5   :  { %v509_v7 = vpop.f32.mrb[4].mxu0  ;;  %v512_v8 = vpop.f32.mrb[4].mxu1 }
 0x2a6   :  { %v393_v9 = vadd.f32 %v509_v7, %v297_v4  ;;  %v403_v10 = vadd.f32 %v512_v8, %v307_v6  ;;  %v387_v11 = vpop.f32.mrb[5].mxu0  ;;  %v397_v12 = vpop.f32.mrb[5].mxu1 }
 0x2a7   :  { %v388_v13 = vadd.f32 %v387_v11, %v292_v3  ;;  %v398_v14 = vadd.f32 %v397_v12, %v302_v5 }
 0x2a8   :  { %v407_v15 = vmax.f32 %v393_v9, 0.0  ;;  %v409_v16 = vmax.f32 %v403_v10, 0.0 }
 0x2a9   :  { %v406_v17 = vmax.f32 %v388_v13, 0.0  ;;  %v408_v18 = vmax.f32 %v398_v14, 0.0 }
 0x2aa   :  { %412 = vst.msk [vmem:[%s676_s3 + $0x8] sm:$0xff] %vm410_vm1, %v407_v15  ;;  %414 = vst.msk [vmem:[%s676_s3 + $0x18] sm:$0xff] %vm410_vm1, %v409_v16 }
 0x2ab   :  { %411 = vst.msk [vmem:[%s676_s3] sm:$0xff] %vm410_vm1, %v406_v17  ;;  %413 = vst.msk [vmem:[%s676_s3 + $0x10] sm:$0xff] %vm410_vm1, %v408_v18 }

</bundles_post_ra>
